<compile_context>
chip_gen: v5e
topology: v5e:2x2
jax: 0.10.0
libtpu: 0.0.40
codegen_flags: <defaults>
</compile_context>

<pallas_src>
import functools

import jax
import jax.numpy as jnp
from jax import lax
from jax.experimental import pallas as pl
from jax.experimental.pallas import tpu as pltpu


_INTERP_TH_MAX = 128        # row-tile cap for the interp kernels
_LOVASZ_SEG_CAP = 256       # 128-lane segments per Lovasz tile (32768 elems/tile)


def _round_up(x, m):
    return ((x + m - 1) // m) * m


@functools.lru_cache(maxsize=1)
def _vmem_limit():
    """Generation-aware scoped-VMEM limit (~100 MiB v5e/v6e, ~56 MiB v7x)."""
    try:
        cap = int(getattr(pltpu.get_tpu_info(), "vmem_capacity_bytes", 0) or 0)
    except Exception:                      # noqa: BLE001 - safe fallback off-TPU
        cap = 0
    if cap <= 0:
        return 48 * 1024 * 1024
    return max(32 * 1024 * 1024, min(100 * 1024 * 1024, cap - 8 * 1024 * 1024))


def _pick_row_tile(hout, cap=_INTERP_TH_MAX):
    """Row tile TH and padded height Hp (Hp % TH == 0, TH % 8 == 0 or TH == Hp)."""
    if hout <= cap:
        return hout, hout
    d = cap - (cap % 8)
    while d >= 8:
        if hout % d == 0:
            return d, hout
        d -= 8
    return cap, _round_up(hout, cap)


def _pick_seg_tile(nseg, cap=_LOVASZ_SEG_CAP):
    """Segments-per-tile for the Lovasz kernel (multiple of 8 or the full dim)."""
    if nseg <= cap:
        return nseg
    d = cap - (cap % 8)
    while d >= 8:
        if nseg % d == 0:
            return d
        d -= 8
    return cap - (cap % 8)   # caller pads nseg up to a multiple of this


# ---------------------------------------------------------------------------
# Bilinear interpolation matrix (align_corners=True)
# ---------------------------------------------------------------------------
def _bilinear_matrix(out_size, in_size):
    o = jnp.arange(out_size, dtype=jnp.float32)
    if out_size > 1:
        src = o * (in_size - 1) / (out_size - 1)
    else:
        src = jnp.zeros_like(o)
    i0 = jnp.clip(jnp.floor(src).astype(jnp.int32), 0, in_size - 1)
    i1 = jnp.minimum(i0 + 1, in_size - 1)
    w1 = src - i0.astype(jnp.float32)
    w0 = 1.0 - w1
    m = jnp.zeros((out_size, in_size), jnp.float32)
    rows = jnp.arange(out_size)
    m = m.at[rows, i0].add(w0)
    m = m.at[rows, i1].add(w1)
    return m


# ---------------------------------------------------------------------------
# Shared bilinear stage: x (C*Hin, Win) --> logits slab (C, TH, Wout) in VMEM
# ---------------------------------------------------------------------------
def _bilinear_to_slab(x_ref, wh_ref, wwt_ref, xw_ref, slab_ref, num_ch, hin):
    # Stage 1 (once per batch item): fold channels into MXU rows.
    #   (C*Hin, Win) @ (Win, Wout) -> (C*Hin, Wout); store the result as bf16.
    @pl.when(pl.program_id(1) == 0)
    def _():
        xw_ref[...] = jnp.dot(x_ref[0], wwt_ref[...],
                              preferred_element_type=jnp.float32
                              ).astype(jnp.bfloat16)

    # Stage 2 (per Hout tile): per-channel H matmul with lane-wide N = Wout.
    wh = wh_ref[...]                                          # (TH, Hin) bf16
    for c in range(num_ch):                                   # C small & static
        slab_ref[c] = jnp.dot(wh, xw_ref[c * hin:(c + 1) * hin, :],
                              preferred_element_type=jnp.float32)


# ---------------------------------------------------------------------------
# Kernel A: bilinear upsample + channel softmax + packed |fg - prob| sort keys
# ---------------------------------------------------------------------------
def _interp_key_kernel(tgt_ref, x_ref, wh_ref, wwt_ref, key_ref,
                       xw_ref, slab_ref, *, num_ch, hin, th, hout, hp):
    _bilinear_to_slab(x_ref, wh_ref, wwt_ref, xw_ref, slab_ref, num_ch, hin)

    slab = slab_ref[...]                                      # (C, TH, W) f32
    m = jnp.max(slab, axis=0, keepdims=True)
    p = jnp.exp(slab - m)
    denom = jnp.sum(p, axis=0, keepdims=True)
    prob = p * pl.reciprocal(denom, approx=True)              # EUP reciprocal

    tgt = tgt_ref[...]                                        # (1, TH, W) int32
    cls = lax.broadcasted_iota(jnp.int32, slab.shape, 0)
    fg_i = (cls == tgt).astype(jnp.int32)
    err = jnp.abs(fg_i.astype(jnp.float32) - prob)            # in [0, 1]

    # Pack err + fg into one int32 sort key.  err >= 0, so its f32 bit pattern
    # orders like the value; key = bits(err)*2 + fg keeps err bit-exact and
    # stays within positive int32 range.
    key = pltpu.bitcast(err, jnp.int32) * 2 + fg_i

    if hp > hout:
        # Rows past the true height (H padded to a multiple of TH) get key 0
        # (err = 0, fg = 0): they sort to the end and contribute nothing.
        row = pl.program_id(1) * th + lax.broadcasted_iota(jnp.int32,
                                                           slab.shape, 1)
        key = jnp.where(row < hout, key, 0)

    # Emit negated so a plain ascending lax.sort yields descending-error order.
    key_ref[...] = jnp.expand_dims(-key, 1)                   # (C, 1, TH, W)


def _interp_softmax_keys(pred, tgt, hout, wout):
    """Returns negated packed sort keys, shape (C, B*Hp*Wout) int32."""
    B, C, Hin, Win = pred.shape
    th, hp = _pick_row_tile(hout)
    nh = hp // th

    wh = _bilinear_matrix(hout, Hin)
    if hp != hout:
        wh = jnp.pad(wh, ((0, hp - hout), (0, 0)))
    wh = wh.astype(jnp.bfloat16)
    wwt = _bilinear_matrix(wout, Win).T.astype(jnp.bfloat16)
    x2d = pred.astype(jnp.bfloat16).reshape(B, C * Hin, Win)
    tgt_i = tgt.astype(jnp.int32)
    if hp != hout:
        tgt_i = jnp.pad(tgt_i, ((0, 0), (0, hp - hout), (0, 0)))

    kern = functools.partial(_interp_key_kernel, num_ch=C, hin=Hin,
                             th=th, hout=hout, hp=hp)
    keys = pl.pallas_call(
        kern,
        out_shape=jax.ShapeDtypeStruct((C, B, hp, wout), jnp.int32),
        grid_spec=pltpu.PrefetchScalarGridSpec(
            num_scalar_prefetch=0,
            grid=(B, nh),
            in_specs=[
                pl.BlockSpec((1, th, wout), lambda b, t: (b, t, 0)),
                pl.BlockSpec((1, C * Hin, Win), lambda b, t: (b, 0, 0)),
                pl.BlockSpec((th, Hin), lambda b, t: (t, 0)),
                pl.BlockSpec((Win, wout), lambda b, t: (0, 0)),
            ],
            out_specs=pl.BlockSpec((C, 1, th, wout), lambda b, t: (0, b, t, 0)),
            scratch_shapes=[pltpu.VMEM((C * Hin, wout), jnp.bfloat16),
                            pltpu.VMEM((C, th, wout), jnp.float32)],
        ),
        compiler_params=pltpu.CompilerParams(
            dimension_semantics=("parallel", "arbitrary"),
            vmem_limit_bytes=_vmem_limit()),
    )(tgt_i, x2d, wh, wwt)

    return keys.reshape(C, B * hp * wout)


# ---------------------------------------------------------------------------
# Kernel B: bilinear upsample fused with cross-entropy (per-batch partial sums)
# ---------------------------------------------------------------------------
def _interp_ce_kernel(tgt_ref, x_ref, wh_ref, wwt_ref, sum_ref,
                      xw_ref, slab_ref, *, num_ch, hin, th, hout, hp):
    t = pl.program_id(1)

    @pl.when(t == 0)
    def _():
        sum_ref[...] = jnp.zeros_like(sum_ref)

    _bilinear_to_slab(x_ref, wh_ref, wwt_ref, xw_ref, slab_ref, num_ch, hin)

    slab = slab_ref[...]                                      # (C, TH, W) f32
    tgt = tgt_ref[...]                                        # (1, TH, W) int32
    m = jnp.max(slab, axis=0, keepdims=True)
    lse = m[0] + jnp.log(jnp.sum(jnp.exp(slab - m), axis=0))  # (TH, W)
    cls = lax.broadcasted_iota(jnp.int32, slab.shape, 0)
    picked = jnp.sum(jnp.where(cls == tgt, slab, 0.0), axis=0)
    nll = lse - picked                                        # (TH, W)

    if hp > hout:
        row = t * th + lax.broadcasted_iota(jnp.int32, nll.shape, 0)
        nll = jnp.where(row < hout, nll, 0.0)

    sum_ref[...] += jnp.sum(nll)                              # broadcast scalar


def _interp_cross_entropy(pred, tgt, hout, wout):
    B, C, Hin, Win = pred.shape
    th, hp = _pick_row_tile(hout)
    nh = hp // th

    wh = _bilinear_matrix(hout, Hin)
    if hp != hout:
        wh = jnp.pad(wh, ((0, hp - hout), (0, 0)))
    wh = wh.astype(jnp.bfloat16)
    wwt = _bilinear_matrix(wout, Win).T.astype(jnp.bfloat16)
    x2d = pred.astype(jnp.bfloat16).reshape(B, C * Hin, Win)
    tgt_i = tgt.astype(jnp.int32)
    if hp != hout:
        tgt_i = jnp.pad(tgt_i, ((0, 0), (0, hp - hout), (0, 0)))

    kern = functools.partial(_interp_ce_kernel, num_ch=C, hin=Hin,
                             th=th, hout=hout, hp=hp)
    out = pl.pallas_call(
        kern,
        out_shape=jax.ShapeDtypeStruct((B, 1, 128), jnp.float32),
        grid_spec=pltpu.PrefetchScalarGridSpec(
            num_scalar_prefetch=0,
            grid=(B, nh),
            in_specs=[
                pl.BlockSpec((1, th, wout), lambda b, t: (b, t, 0)),
                pl.BlockSpec((1, C * Hin, Win), lambda b, t: (b, 0, 0)),
                pl.BlockSpec((th, Hin), lambda b, t: (t, 0)),
                pl.BlockSpec((Win, wout), lambda b, t: (0, 0)),
            ],
            out_specs=pl.BlockSpec((1, 1, 128), lambda b, t: (b, 0, 0)),
            scratch_shapes=[pltpu.VMEM((C * Hin, wout), jnp.bfloat16),
                            pltpu.VMEM((C, th, wout), jnp.float32)],
        ),
        compiler_params=pltpu.CompilerParams(
            dimension_semantics=("parallel", "arbitrary"),
            vmem_limit_bytes=_vmem_limit()),
    )(tgt_i, x2d, wh, wwt)

    total = jnp.sum(out[:, 0, 0])
    return total / float(B * hout * wout)


# ---------------------------------------------------------------------------
# Kernel C: Lovasz-Softmax per-class loss on sorted packed keys
# ---------------------------------------------------------------------------
def _lovasz_kernel(keys_ref, gts_ref, loss_ref, cum_ref, *, seg_tile, num_ch):
    t = pl.program_id(0)

    @pl.when(t == 0)
    def _():
        cum_ref[...] = jnp.zeros_like(cum_ref)
        loss_ref[...] = jnp.zeros_like(loss_ref)

    k = -keys_ref[...]                                  # (C, S, 128) int32 >= 0
    fg_i = jnp.bitwise_and(k, 1)
    err = pltpu.bitcast(jnp.right_shift(k, 1), jnp.float32)   # exact err
    fg = fg_i.astype(jnp.float32)
    gts = gts_ref[...]                                  # (C, 1)
    gts_b = gts[:, :, None]                             # (C, 1, 1)

    # Inclusive cumsum of fg along the flattened (S, 128) order --------------
    # Intra-segment (128 lanes): one MXU matmul with an upper-triangular ones
    # matrix; fg is 0/1 and partial sums <= 128, so bf16 x bf16 -> f32 is exact.
    li = lax.broadcasted_iota(jnp.int32, (128, 128), 0)
    lj = lax.broadcasted_iota(jnp.int32, (128, 128), 1)
    tri_incl = (li <= lj).astype(jnp.bfloat16)
    fg2 = fg.astype(jnp.bfloat16).reshape(num_ch * seg_tile, 128)
    intra = jnp.dot(fg2, tri_incl, preferred_element_type=jnp.float32)
    intra = intra.reshape(num_ch, seg_tile, 128)

    # Cross-segment carry: lane-reduce the segment totals then a small
    # strictly-upper-triangular matmul for the exclusive prefix over segments.
    seg_tot = jnp.sum(fg, axis=2)                       # (C, S) f32, <= 128
    si = lax.broadcasted_iota(jnp.int32, (seg_tile, seg_tile), 0)
    sj = lax.broadcasted_iota(jnp.int32, (seg_tile, seg_tile), 1)
    tri_excl = (si < sj).astype(jnp.bfloat16)
    carry = jnp.dot(seg_tot.astype(jnp.bfloat16), tri_excl,
                    preferred_element_type=jnp.float32)       # (C, S)
    cum_fg = intra + (carry + cum_ref[...])[:, :, None]       # (C, S, 128)

    # Global 1-based position of each element.
    s_idx = lax.broadcasted_iota(jnp.int32, cum_fg.shape, 1)
    l_idx = lax.broadcasted_iota(jnp.int32, cum_fg.shape, 2)
    pos = (t * (seg_tile * 128) + s_idx * 128 + l_idx + 1).astype(jnp.float32)

    # Lovasz gradient: jaccard_i - jaccard_{i-1}; the previous element's
    # jaccard follows analytically from cum_fg - fg (no rolls / carried prevj).
    inter = gts_b - cum_fg
    union = gts_b + pos - cum_fg                        # >= 1 everywhere
    jac = 1.0 - inter / union                           # exact divide
    cum_p = cum_fg - fg
    union_p = jnp.maximum(gts_b + (pos - 1.0) - cum_p, 1.0)
    jac_p = jnp.where(pos > 1.0, 1.0 - (gts_b - cum_p) / union_p, 0.0)
    grad = jac - jac_p

    contrib = jnp.sum(jnp.sum(err * grad, axis=2), axis=1, keepdims=True)
    loss_ref[...] += contrib                            # (C, 1) accumulator
    cum_ref[...] += jnp.sum(seg_tot, axis=1, keepdims=True)


def _lovasz_losses(neg_keys, gts):
    """neg_keys: (C, P) negated packed keys; gts: (C,) fg counts. -> (C,) loss."""
    C, P = neg_keys.shape

    # TODO(synk): descending sort in plain JAX (no Pallas TPU sort primitive);
    # the keys are pre-negated so a single-operand ascending sort suffices.
    sorted_keys = lax.sort(neg_keys, dimension=-1, is_stable=False)

    p_pad = _round_up(P, 128)
    nseg = p_pad // 128
    seg_tile = _pick_seg_tile(nseg)
    nseg_pad = _round_up(nseg, seg_tile)
    total = nseg_pad * 128
    if total != P:
        # Key 0 == (err=0, fg=0): stays sorted at the end, contributes nothing.
        sorted_keys = jnp.pad(sorted_keys, ((0, 0), (0, total - P)))
    keys3 = sorted_keys.reshape(C, nseg_pad, 128)
    n_tiles = nseg_pad // seg_tile
    gts2 = gts.reshape(C, 1).astype(jnp.float32)

    losses = pl.pallas_call(
        functools.partial(_lovasz_kernel, seg_tile=seg_tile, num_ch=C),
        out_shape=jax.ShapeDtypeStruct((C, 1), jnp.float32),
        grid_spec=pltpu.PrefetchScalarGridSpec(
            num_scalar_prefetch=0,
            grid=(n_tiles,),
            in_specs=[pl.BlockSpec((C, seg_tile, 128), lambda t: (0, t, 0)),
                      pl.BlockSpec((C, 1), lambda t: (0, 0))],
            out_specs=pl.BlockSpec((C, 1), lambda t: (0, 0)),
            scratch_shapes=[pltpu.VMEM((C, 1), jnp.float32)],
        ),
        compiler_params=pltpu.CompilerParams(
            dimension_semantics=("arbitrary",),
            vmem_limit_bytes=_vmem_limit()),
    )(keys3, gts2)

    return losses[:, 0]


# ---------------------------------------------------------------------------
# Loss module
# ---------------------------------------------------------------------------
class ABRLovaszLossPallas:
    """Pallas TPU implementation of ABRLovaszLoss.forward (ignore_index=None)."""

    def __init__(self, ignore_index=None, only_present=True):
        # TODO(synk): ignore_index!=None requires dynamic-length valid-pixel
        # filtering (data-dependent shapes); only the default (None) is supported.
        assert ignore_index is None
        self.ignore_index = ignore_index
        self.only_present = only_present
        # Defined for parity with the reference __init__; unused in forward
        # (the reference criterion is built with weight=None).
        self.weight = jnp.array(
            [0.80777327, 1.00125961, 0.90997236, 1.10867908, 1.17541499,
             0.86041422, 1.01116758, 0.89290045, 1.12410812, 0.91105395,
             1.07604013, 1.1247061, 1.09895196, 0.90172057, 0.93529453,
             0.93054733, 1.04919178, 1.04937547, 1.06267568, 1.06365688],
            dtype=jnp.float32)

    def __call__(self, preds, targets):
        h, w = targets[0].shape[1], targets[0].shape[2]

        # All Lovasz heads share the same upsampled pixel grid: concatenate
        # their packed keys along the class axis -> ONE sort + ONE Lovasz call.
        keys_list = [_interp_softmax_keys(p, t, h, w)
                     for p, t in zip(preds[:3], targets[:3])]
        keys = jnp.concatenate(keys_list, axis=0)         # (C_total, P) int32
        gts = jnp.sum(jnp.bitwise_and(keys, 1), axis=-1).astype(jnp.float32)
        losses = _lovasz_losses(keys, gts)                # (C_total,)
        present = (gts > 0.0).astype(jnp.float32)

        offs = [0]
        for p in preds[:3]:
            offs.append(offs[-1] + p.shape[1])

        def head_mean(lo, hi):
            l = losses[lo:hi]
            m = present[lo:hi] if self.only_present else jnp.ones(
                (hi - lo,), jnp.float32)
            cnt = jnp.sum(m)
            tot = jnp.sum(l * m)
            return jnp.where(cnt > 0, tot / jnp.maximum(cnt, 1.0), 0.0)

        loss = head_mean(offs[0], offs[1])
        loss_hb = head_mean(offs[1], offs[2])
        loss_fb = head_mean(offs[2], offs[3])
        loss_dsn = _interp_cross_entropy(preds[-1], targets[0], h, w)

        return loss + 0.4 * loss_hb + 0.4 * loss_fb + 0.4 * loss_dsn


if __name__ == "__main__":
    key = jax.random.PRNGKey(0)
    B, H, W = 2, 16, 16       # target (full) spatial size
    Hin, Win = 8, 8           # prediction spatial size (upsampled 2x in-kernel)
    C_main, C_hb, C_fb = 8, 4, 2
    ks = jax.random.split(key, 8)

    preds = [
        jax.random.normal(ks[0], (B, C_main, Hin, Win), jnp.float32),
        jax.random.normal(ks[1], (B, C_hb, Hin, Win), jnp.float32),
        jax.random.normal(ks[2], (B, C_fb, Hin, Win), jnp.float32),
        jax.random.normal(ks[3], (B, C_main, Hin, Win), jnp.float32),  # dsn head
    ]
    targets = [
        jax.random.randint(ks[4], (B, H, W), 0, C_main, dtype=jnp.int32),
        jax.random.randint(ks[5], (B, H, W), 0, C_hb, dtype=jnp.int32),
        jax.random.randint(ks[6], (B, H, W), 0, C_fb, dtype=jnp.int32),
    ]

    loss_fn = ABRLovaszLossPallas(ignore_index=None, only_present=True)
    out = jax.block_until_ready(loss_fn(preds, targets))
    assert out.shape == () and bool(jnp.isfinite(out))
    print("KERNEL_OK")
</pallas_src>

<mosaic_0001>
module attributes {stable_mosaic.version = 11 : i64} {
  func.func @_interp_key_kernel(%arg0: i32, %arg1: i32, %arg2: memref<1x16x16xi32, #tpu.memory_space<vmem>>, %arg3: memref<1x64x8xbf16, #tpu.memory_space<vmem>>, %arg4: memref<16x8xbf16, #tpu.memory_space<vmem>>, %arg5: memref<8x16xbf16, #tpu.memory_space<vmem>>, %arg6: memref<8x1x16x16xi32, #tpu.memory_space<vmem>>, %arg7: memref<64x16xbf16, #tpu.memory_space<vmem>>, %arg8: memref<8x16x16xf32, #tpu.memory_space<vmem>>) attributes {dimension_semantics = [#tpu.dimension_semantics<parallel>, #tpu.dimension_semantics<arbitrary>], iteration_bounds = array<i64: 2, 1>, scalar_prefetch = 0 : i64, scratch_operands = 2 : i64, tpu.core_type = #tpu.core_type<tc>, window_params = [{transform_indices = @transform_0, window_bounds = array<i64: 1, 16, 16>}, {transform_indices = @transform_1, window_bounds = array<i64: 1, 64, 8>}, {transform_indices = @transform_2, window_bounds = array<i64: 16, 8>}, {pipeline_mode = #tpu.pipeline_mode<synchronous>, transform_indices = @transform_3, window_bounds = array<i64: 8, 16>}, {transform_indices = @transform_4, window_bounds = array<i64: 8, 1, 16, 16>}]} {
    %c0_i32 = arith.constant 0 : i32
    %0 = arith.cmpi eq, %arg1, %c0_i32 : i32
    %1 = arith.extui %0 : i1 to i32
    %c0_i32_0 = arith.constant 0 : i32
    %2 = arith.cmpi ne, %1, %c0_i32_0 : i32
    scf.if %2 {
      %c0_48 = arith.constant 0 : index
      %c0_49 = arith.constant 0 : index
      %c0_50 = arith.constant 0 : index
      %71 = vector.load %arg3[%c0_48, %c0_49, %c0_50] : memref<1x64x8xbf16, #tpu.memory_space<vmem>>, vector<1x64x8xbf16>
      %72 = vector.shape_cast %71 : vector<1x64x8xbf16> to vector<64x8xbf16>
      %c0_51 = arith.constant 0 : index
      %c0_52 = arith.constant 0 : index
      %73 = vector.load %arg5[%c0_51, %c0_52] : memref<8x16xbf16, #tpu.memory_space<vmem>>, vector<8x16xbf16>
      %cst_53 = arith.constant dense<0.000000e+00> : vector<64x16xf32>
      %74 = tpu.matmul %72, %73, %cst_53 {dimension_numbers = #tpu.dot_dimension_numbers<[1], [0], [0], [1], [0, 0, 1, 1], [], []>} : vector<64x8xbf16>, vector<8x16xbf16>, vector<64x16xf32> -> vector<64x16xf32>
      %75 = arith.truncf %74 : vector<64x16xf32> to vector<64x16xbf16>
      %c0_54 = arith.constant 0 : index
      %c0_55 = arith.constant 0 : index
      %76 = vector.load %arg7[%c0_54, %c0_55] : memref<64x16xbf16, #tpu.memory_space<vmem>>, vector<64x16xbf16>
      tpu.vector_store %arg7[%c0_54, %c0_55], %75 {strides = array<i32>} : memref<64x16xbf16, #tpu.memory_space<vmem>>, vector<64x16xbf16>,
    } else {
    }
    %c0 = arith.constant 0 : index
    %c0_1 = arith.constant 0 : index
    %3 = vector.load %arg4[%c0, %c0_1] : memref<16x8xbf16, #tpu.memory_space<vmem>>, vector<16x8xbf16>
    %c0_2 = arith.constant 0 : index
    %c0_3 = arith.constant 0 : index
    %4 = vector.load %arg7[%c0_2, %c0_3] : memref<64x16xbf16, #tpu.memory_space<vmem>>, vector<8x16xbf16>
    %cst = arith.constant dense<0.000000e+00> : vector<16x16xf32>
    %5 = tpu.matmul %3, %4, %cst {dimension_numbers = #tpu.dot_dimension_numbers<[1], [0], [0], [1], [0, 0, 1, 1], [], []>} : vector<16x8xbf16>, vector<8x16xbf16>, vector<16x16xf32> -> vector<16x16xf32>
    %c0_4 = arith.constant 0 : index
    %c0_5 = arith.constant 0 : index
    %c0_6 = arith.constant 0 : index
    %6 = vector.load %arg8[%c0_4, %c0_5, %c0_6] : memref<8x16x16xf32, #tpu.memory_space<vmem>>, vector<1x16x16xf32>
    %7 = vector.shape_cast %6 : vector<1x16x16xf32> to vector<16x16xf32>
    %8 = vector.shape_cast %5 : vector<16x16xf32> to vector<1x16x16xf32>
    tpu.vector_store %arg8[%c0_4, %c0_5, %c0_6], %8 {strides = array<i32>} : memref<8x16x16xf32, #tpu.memory_space<vmem>>, vector<1x16x16xf32>,
    %c8 = arith.constant 8 : index
    %c0_7 = arith.constant 0 : index
    %9 = vector.load %arg7[%c8, %c0_7] : memref<64x16xbf16, #tpu.memory_space<vmem>>, vector<8x16xbf16>
    %cst_8 = arith.constant dense<0.000000e+00> : vector<16x16xf32>
    %10 = tpu.matmul %3, %9, %cst_8 {dimension_numbers = #tpu.dot_dimension_numbers<[1], [0], [0], [1], [0, 0, 1, 1], [], []>} : vector<16x8xbf16>, vector<8x16xbf16>, vector<16x16xf32> -> vector<16x16xf32>
    %c1 = arith.constant 1 : index
    %c0_9 = arith.constant 0 : index
    %c0_10 = arith.constant 0 : index
    %11 = vector.load %arg8[%c1, %c0_9, %c0_10] : memref<8x16x16xf32, #tpu.memory_space<vmem>>, vector<1x16x16xf32>
    %12 = vector.shape_cast %11 : vector<1x16x16xf32> to vector<16x16xf32>
    %13 = vector.shape_cast %10 : vector<16x16xf32> to vector<1x16x16xf32>
    tpu.vector_store %arg8[%c1, %c0_9, %c0_10], %13 {strides = array<i32>} : memref<8x16x16xf32, #tpu.memory_space<vmem>>, vector<1x16x16xf32>,
    %c16 = arith.constant 16 : index
    %c0_11 = arith.constant 0 : index
    %14 = vector.load %arg7[%c16, %c0_11] : memref<64x16xbf16, #tpu.memory_space<vmem>>, vector<8x16xbf16>
    %cst_12 = arith.constant dense<0.000000e+00> : vector<16x16xf32>
    %15 = tpu.matmul %3, %14, %cst_12 {dimension_numbers = #tpu.dot_dimension_numbers<[1], [0], [0], [1], [0, 0, 1, 1], [], []>} : vector<16x8xbf16>, vector<8x16xbf16>, vector<16x16xf32> -> vector<16x16xf32>
    %c2 = arith.constant 2 : index
    %c0_13 = arith.constant 0 : index
    %c0_14 = arith.constant 0 : index
    %16 = vector.load %arg8[%c2, %c0_13, %c0_14] : memref<8x16x16xf32, #tpu.memory_space<vmem>>, vector<1x16x16xf32>
    %17 = vector.shape_cast %16 : vector<1x16x16xf32> to vector<16x16xf32>
    %18 = vector.shape_cast %15 : vector<16x16xf32> to vector<1x16x16xf32>
    tpu.vector_store %arg8[%c2, %c0_13, %c0_14], %18 {strides = array<i32>} : memref<8x16x16xf32, #tpu.memory_space<vmem>>, vector<1x16x16xf32>,
    %c24 = arith.constant 24 : index
    %c0_15 = arith.constant 0 : index
    %19 = vector.load %arg7[%c24, %c0_15] : memref<64x16xbf16, #tpu.memory_space<vmem>>, vector<8x16xbf16>
    %cst_16 = arith.constant dense<0.000000e+00> : vector<16x16xf32>
    %20 = tpu.matmul %3, %19, %cst_16 {dimension_numbers = #tpu.dot_dimension_numbers<[1], [0], [0], [1], [0, 0, 1, 1], [], []>} : vector<16x8xbf16>, vector<8x16xbf16>, vector<16x16xf32> -> vector<16x16xf32>
    %c3 = arith.constant 3 : index
    %c0_17 = arith.constant 0 : index
    %c0_18 = arith.constant 0 : index
    %21 = vector.load %arg8[%c3, %c0_17, %c0_18] : memref<8x16x16xf32, #tpu.memory_space<vmem>>, vector<1x16x16xf32>
    %22 = vector.shape_cast %21 : vector<1x16x16xf32> to vector<16x16xf32>
    %23 = vector.shape_cast %20 : vector<16x16xf32> to vector<1x16x16xf32>
    tpu.vector_store %arg8[%c3, %c0_17, %c0_18], %23 {strides = array<i32>} : memref<8x16x16xf32, #tpu.memory_space<vmem>>, vector<1x16x16xf32>,
    %c32 = arith.constant 32 : index
    %c0_19 = arith.constant 0 : index
    %24 = vector.load %arg7[%c32, %c0_19] : memref<64x16xbf16, #tpu.memory_space<vmem>>, vector<8x16xbf16>
    %cst_20 = arith.constant dense<0.000000e+00> : vector<16x16xf32>
    %25 = tpu.matmul %3, %24, %cst_20 {dimension_numbers = #tpu.dot_dimension_numbers<[1], [0], [0], [1], [0, 0, 1, 1], [], []>} : vector<16x8xbf16>, vector<8x16xbf16>, vector<16x16xf32> -> vector<16x16xf32>
    %c4 = arith.constant 4 : index
    %c0_21 = arith.constant 0 : index
    %c0_22 = arith.constant 0 : index
    %26 = vector.load %arg8[%c4, %c0_21, %c0_22] : memref<8x16x16xf32, #tpu.memory_space<vmem>>, vector<1x16x16xf32>
    %27 = vector.shape_cast %26 : vector<1x16x16xf32> to vector<16x16xf32>
    %28 = vector.shape_cast %25 : vector<16x16xf32> to vector<1x16x16xf32>
    tpu.vector_store %arg8[%c4, %c0_21, %c0_22], %28 {strides = array<i32>} : memref<8x16x16xf32, #tpu.memory_space<vmem>>, vector<1x16x16xf32>,
    %c40 = arith.constant 40 : index
    %c0_23 = arith.constant 0 : index
    %29 = vector.load %arg7[%c40, %c0_23] : memref<64x16xbf16, #tpu.memory_space<vmem>>, vector<8x16xbf16>
    %cst_24 = arith.constant dense<0.000000e+00> : vector<16x16xf32>
    %30 = tpu.matmul %3, %29, %cst_24 {dimension_numbers = #tpu.dot_dimension_numbers<[1], [0], [0], [1], [0, 0, 1, 1], [], []>} : vector<16x8xbf16>, vector<8x16xbf16>, vector<16x16xf32> -> vector<16x16xf32>
    %c5 = arith.constant 5 : index
    %c0_25 = arith.constant 0 : index
    %c0_26 = arith.constant 0 : index
    %31 = vector.load %arg8[%c5, %c0_25, %c0_26] : memref<8x16x16xf32, #tpu.memory_space<vmem>>, vector<1x16x16xf32>
    %32 = vector.shape_cast %31 : vector<1x16x16xf32> to vector<16x16xf32>
    %33 = vector.shape_cast %30 : vector<16x16xf32> to vector<1x16x16xf32>
    tpu.vector_store %arg8[%c5, %c0_25, %c0_26], %33 {strides = array<i32>} : memref<8x16x16xf32, #tpu.memory_space<vmem>>, vector<1x16x16xf32>,
    %c48 = arith.constant 48 : index
    %c0_27 = arith.constant 0 : index
    %34 = vector.load %arg7[%c48, %c0_27] : memref<64x16xbf16, #tpu.memory_space<vmem>>, vector<8x16xbf16>
    %cst_28 = arith.constant dense<0.000000e+00> : vector<16x16xf32>
    %35 = tpu.matmul %3, %34, %cst_28 {dimension_numbers = #tpu.dot_dimension_numbers<[1], [0], [0], [1], [0, 0, 1, 1], [], []>} : vector<16x8xbf16>, vector<8x16xbf16>, vector<16x16xf32> -> vector<16x16xf32>
    %c6 = arith.constant 6 : index
    %c0_29 = arith.constant 0 : index
    %c0_30 = arith.constant 0 : index
    %36 = vector.load %arg8[%c6, %c0_29, %c0_30] : memref<8x16x16xf32, #tpu.memory_space<vmem>>, vector<1x16x16xf32>
    %37 = vector.shape_cast %36 : vector<1x16x16xf32> to vector<16x16xf32>
    %38 = vector.shape_cast %35 : vector<16x16xf32> to vector<1x16x16xf32>
    tpu.vector_store %arg8[%c6, %c0_29, %c0_30], %38 {strides = array<i32>} : memref<8x16x16xf32, #tpu.memory_space<vmem>>, vector<1x16x16xf32>,
    %c56 = arith.constant 56 : index
    %c0_31 = arith.constant 0 : index
    %39 = vector.load %arg7[%c56, %c0_31] : memref<64x16xbf16, #tpu.memory_space<vmem>>, vector<8x16xbf16>
    %cst_32 = arith.constant dense<0.000000e+00> : vector<16x16xf32>
    %40 = tpu.matmul %3, %39, %cst_32 {dimension_numbers = #tpu.dot_dimension_numbers<[1], [0], [0], [1], [0, 0, 1, 1], [], []>} : vector<16x8xbf16>, vector<8x16xbf16>, vector<16x16xf32> -> vector<16x16xf32>
    %c7 = arith.constant 7 : index
    %c0_33 = arith.constant 0 : index
    %c0_34 = arith.constant 0 : index
    %41 = vector.load %arg8[%c7, %c0_33, %c0_34] : memref<8x16x16xf32, #tpu.memory_space<vmem>>, vector<1x16x16xf32>
    %42 = vector.shape_cast %41 : vector<1x16x16xf32> to vector<16x16xf32>
    %43 = vector.shape_cast %40 : vector<16x16xf32> to vector<1x16x16xf32>
    tpu.vector_store %arg8[%c7, %c0_33, %c0_34], %43 {strides = array<i32>} : memref<8x16x16xf32, #tpu.memory_space<vmem>>, vector<1x16x16xf32>,
    %c0_35 = arith.constant 0 : index
    %c0_36 = arith.constant 0 : index
    %c0_37 = arith.constant 0 : index
    %44 = vector.load %arg8[%c0_35, %c0_36, %c0_37] : memref<8x16x16xf32, #tpu.memory_space<vmem>>, vector<8x16x16xf32>
    %cst_38 = arith.constant dense<0xFF800000> : vector<16x16xf32>
    %45 = vector.multi_reduction <maximumf>, %44, %cst_38 [0] : vector<8x16x16xf32> to vector<16x16xf32>
    %46 = vector.shape_cast %45 : vector<16x16xf32> to vector<1x16x16xf32>
    %47 = vector.broadcast %46 : vector<1x16x16xf32> to vector<8x16x16xf32>
    %48 = arith.subf %44, %47 : vector<8x16x16xf32>
    %49 = math.exp %48 : vector<8x16x16xf32>
    %cst_39 = arith.constant dense<0.000000e+00> : vector<16x16xf32>
    %50 = vector.multi_reduction <add>, %49, %cst_39 [0] : vector<8x16x16xf32> to vector<16x16xf32>
    %51 = vector.shape_cast %50 : vector<16x16xf32> to vector<1x16x16xf32>
    %52 = tpu.reciprocal %51 {approx = true} : vector<1x16x16xf32> -> vector<1x16x16xf32>
    %53 = vector.broadcast %52 : vector<1x16x16xf32> to vector<8x16x16xf32>
    %54 = arith.mulf %49, %53 : vector<8x16x16xf32>
    %c0_40 = arith.constant 0 : index
    %c0_41 = arith.constant 0 : index
    %c0_42 = arith.constant 0 : index
    %55 = vector.load %arg2[%c0_40, %c0_41, %c0_42] : memref<1x16x16xi32, #tpu.memory_space<vmem>>, vector<1x16x16xi32>
    %56 = tpu.iota {dimensions = array<i32: 0>} : vector<8x16x16xi32>
    %57 = vector.broadcast %55 : vector<1x16x16xi32> to vector<8x16x16xi32>
    %58 = arith.cmpi eq, %56, %57 : vector<8x16x16xi32>
    %59 = arith.extui %58 : vector<8x16x16xi1> to vector<8x16x16xi32>
    %60 = arith.sitofp %59 : vector<8x16x16xi32> to vector<8x16x16xf32>
    %61 = arith.subf %60, %54 : vector<8x16x16xf32>
    %62 = math.absf %61 : vector<8x16x16xf32>
    %63 = tpu.bitcast %62 : vector<8x16x16xf32> -> vector<8x16x16xi32>
    %c2_i32 = arith.constant 2 : i32
    %64 = vector.broadcast %c2_i32 : i32 to vector<8x16x16xi32>
    %65 = arith.muli %63, %64 : vector<8x16x16xi32>
    %66 = arith.addi %65, %59 : vector<8x16x16xi32>
    %c0_i32_43 = arith.constant 0 : i32
    %67 = vector.broadcast %c0_i32_43 : i32 to vector<8x16x16xi32>
    %68 = arith.subi %67, %66 : vector<8x16x16xi32>
    %69 = vector.shape_cast %68 : vector<8x16x16xi32> to vector<8x1x16x16xi32>
    %c0_44 = arith.constant 0 : index
    %c0_45 = arith.constant 0 : index
    %c0_46 = arith.constant 0 : index
    %c0_47 = arith.constant 0 : index
    %70 = vector.load %arg6[%c0_44, %c0_45, %c0_46, %c0_47] : memref<8x1x16x16xi32, #tpu.memory_space<vmem>>, vector<8x1x16x16xi32>
    tpu.vector_store %arg6[%c0_44, %c0_45, %c0_46, %c0_47], %69 {strides = array<i32>} : memref<8x1x16x16xi32, #tpu.memory_space<vmem>>, vector<8x1x16x16xi32>,
    return
  }
  func.func @transform_0(%arg0: i32, %arg1: i32) -> (i32, i32, i32) {
    %c0_i32 = arith.constant 0 : i32
    %c0_i32_0 = arith.constant 0 : i32
    return %arg0, %arg1, %c0_i32 : i32, i32, i32
  }
  func.func @transform_1(%arg0: i32, %arg1: i32) -> (i32, i32, i32) {
    %c0_i32 = arith.constant 0 : i32
    %c0_i32_0 = arith.constant 0 : i32
    %c0_i32_1 = arith.constant 0 : i32
    return %arg0, %c0_i32, %c0_i32_0 : i32, i32, i32
  }
  func.func @transform_2(%arg0: i32, %arg1: i32) -> (i32, i32) {
    %c0_i32 = arith.constant 0 : i32
    %c0_i32_0 = arith.constant 0 : i32
    return %arg1, %c0_i32 : i32, i32
  }
  func.func @transform_3(%arg0: i32, %arg1: i32) -> (i32, i32) {
    %c0_i32 = arith.constant 0 : i32
    %c0_i32_0 = arith.constant 0 : i32
    %c0_i32_1 = arith.constant 0 : i32
    return %c0_i32, %c0_i32_0 : i32, i32
  }
  func.func @transform_4(%arg0: i32, %arg1: i32) -> (i32, i32, i32, i32) {
    %c0_i32 = arith.constant 0 : i32
    %c0_i32_0 = arith.constant 0 : i32
    %c0_i32_1 = arith.constant 0 : i32
    return %c0_i32, %arg0, %arg1, %c0_i32_0 : i32, i32, i32, i32
  }
}

</mosaic_0001>

<bundles_post_ra>
// kernel: tpu_custom_call.1
= control target key start
LH: loop header
LB: loop body
LE: loop exit
PB: predicated region body
PF: predicated region fallthrough
CT: control target
= control target key end

     0   :  { %9 = vsyncpa [#allocation5], 0  ;;  %s1651_s0 = inlined_call_operand.vmem [shape: s32[2,16,16], index: 0, kind: input, shape index: {}]   ;;  %s1652_s1 = inlined_call_operand.vmem [shape: bf16[2,64,8], index: 1, kind: input, shape index: {}]   ;;  %s1653_s2 = inlined_call_operand.vmem [shape: bf16[16,8], index: 2, kind: input, shape index: {}]   ;;  %s1654_s3 = inlined_call_operand.vmem [shape: bf16[8,16], index: 3, kind: input, shape index: {}]   ;;  %s1655_s4 = inlined_call_operand.hbm [shape: s32[8,2,16,16], index: 4, kind: output, shape index: {}]  }
   0x1   :  { %11 = vsyncpa [#allocation5 + $0x1], 0  ;;  %s1262_s15 = smov 0   ;;  %s1264_s16 = smov 0  }
   0x2   :  { %s1266_s17 = smov 0   ;;  %s1268_s18 = smov 0  }
   0x3   :  { %s1270_s19 = smov 0   ;;  %s1272_s20 = smov 0  }
   0x4 LB: > { %s997_s21 = sadd.s32 4294967295, %s1226_s20   ;;  %s998_s22 = sadd.s32 4294967294, %s1226_s20   ;;  %s1226_s20 = sphi %s1272_s20, %s17_s20   ;;  %s1222_s19 = sphi %s1270_s19, %s1662_s19   ;;  %s1218_s18 = sphi %s1268_s18, %s1661_s18   ;;  %s1214_s17 = sphi %s1266_s17, %s1660_s17   ;;  %s1210_s16 = sphi %s1264_s16, %s1659_s16   ;;  %s1206_s15 = sphi %s1262_s15, %s1658_s15  }
   0x5   : > { %s29_s23 = sadd.s32 1, %s1222_s19  ;;  %s139_s24 = sadd.s32 1, %s1214_s17 }
   0x6   : > { %p31_p0 = scmp.ge.s32.totalorder %s29_s23, 2  ;;  %p149_p1 = scmp.ne.s32.totalorder %s1214_s17, %s1210_s16 }
   0x7   : > { %p150_p2 = scmp.eq.s32.totalorder %s997_s21, 1  ;;  %p155_p3 = scmp.ne.s32.totalorder %s1210_s16, %s1206_s15 }
   0x8   : > { %s1664_s23 = smov (%p31_p0, %s29_s23), 0  ;;  %p156_p5 = scmp.eq.s32.totalorder %s998_s22, 1 }
   0x9   : > { %p1302_p4 = por %p150_p2, %p149_p1  ;;  %s134_s26 = ssub.s32 %s1222_s19, %s1664_s23 }
   0xa   : > { %p1002_p6 = scmp.ge.s32.totalorder %s1226_s20, 1  ;;  %p137_p7 = scmp.eq.s32.totalorder %s134_s26, 0 }
   0xb   : > { %p1309_p8 = por %p156_p5, %p155_p3  ;;  %p207_p9 = scmp.lt.s32.totalorder %s1226_s20, 3 }
   0xc   : > { %s1315_s28 = scalar_select %p137_p7, %s1214_s17, %s139_s24  }
   0xd   : > { %p208_p10 = pnand %p1002_p6, %p207_p9 }
   0xe   : > { %p248_p11 = scmp.lt.s32.totalorder (!%p208_p10), %s1218_s18, 1  ;;  %s244_s12 = sand.u32 (!%p208_p10), 1, %s1210_s16  }
   0xf   : > { %211 = sbr.rel (%p208_p10) target bundleno = 440 (0x1b8), region = 36  ;;  %s1530_s24 = sshll.u32 (!%p208_p10), %s244_s12, 7 }
  0x10   : > { %s1534_s26 = scalar_lea.vmem (!%p208_p10), [#allocation4], %s1530_s24  ;;  %s851_s29 = scalar_lea.sflag (!%p208_p10), [#allocation5], %s244_s12 }
  0x14   : > { %v282_v0 = vld [vmem:[%s1654_s3] sm:$0xf]  ;;  %vm316_vm0 = vcmask 1043456   ;;  %s1323_s5 = scalar_select %p248_p11, %s1218_s18, 1  ;;  %vm303_vm1 = vcmask 64512   ;;  %vm357_vm2 = vcmask 125952  }
  0x15   : > { %v318_v1 = vsel %vm316_vm0, %v282_v0, 0  ;;  %v1067_v14 = vld [vmem:[%s1653_s2] sm:$0xff]  ;;  %vm396_vm3 = vcmask 130048  }
  0x16   : > { %327 = vmatpush.bf16.msra.mxu0 %v318_v1  ;;  %1069 = vmatpush.bf16.msra.mxu3 %v318_v1  ;;  %s1062_s6 = sshll.u32 %s1323_s5, 5  ;;  %s1061_s13 = sshll.u32 %s1323_s5, 4 }
  0x17   : > { %s261_s9 = scalar_lea.vmem %s1652_s1, %s1062_s6  ;;  %s1447_s22 = scalar_lea.vmem %s1651_s0, %s1061_s13 }
  0x18   : > { %v1063_v2 = vld [vmem:[%s261_s9] sm:$0xff]  ;;  %v1066_v3 = vld [vmem:[%s261_s9 + $0x18] sm:$0xff]  ;;  %v1064_v4 = vld [vmem:[%s261_s9 + $0x8] sm:$0xff] }
  0x19   : > { %1024 = vmatmul.msk.bf16.vlgmr.msra.gmra.mxu0 %vm303_vm1, %v1063_v2  ;;  %1027 = vmatmul.msk.bf16.vlgmr.msra.gmra.mxu3 %vm303_vm1, %v1066_v3  ;;  %v1065_v5 = vld [vmem:[%s261_s9 + $0x10] sm:$0xff] }
  0x29   : > { %1025 = vmatmul.msk.bf16.gmra.mxu0 %vm303_vm1, %v1064_v4 }
  0x39   : > { %1026 = vmatmul.msk.bf16.gmra.mxu0 %vm303_vm1, %v1065_v5 }
  0x96   : > { %v329_v6 = vpop.f32.mrf.mxu0 }
  0x97   : > { %v349_v7 = vpack.c.bf16 %v329_v6, %v329_v6 }
  0x99   : > { %358 = vst.msk [vmem:[#allocation2] sm:$0xf] %vm357_vm2, %v349_v7 }
  0x9c   : > { %v344_v8 = vpop.f32.mrf.mxu3 }
  0x9d   : > { %v355_v10 = vpack.c.bf16 %v344_v8, %v344_v8 }
  0x9e   : > { %v331_v9 = vpop.f32.mrf.mxu0 }
  0x9f   : > { %v350_v11 = vpack.c.bf16 %v331_v9, %v331_v9  ;;  %364 = vst.msk [vmem:[#allocation2 + $0x18] sm:$0xf] %vm357_vm2, %v355_v10 }
  0xa0   : > { %v368_v12 = vld [vmem:[#allocation2] sm:$0xf] }
  0xa1   : > { %359 = vst.msk [vmem:[#allocation2 + $0x4] sm:$0xf] %vm357_vm2, %v350_v11  ;;  %v380_v13 = vsel %vm316_vm0, %v368_v12, 0 }
  0xa2   : > { %389 = vmatpush.bf16.msra.mxu1 %v380_v13 }
  0xa4   : > { %v346_v15 = vpop.f32.mrf.mxu3 }
  0xa5   : > { %1032 = vmatmul.msk.bf16.vlgmr.msra.gmra.mxu1 %vm303_vm1, %v1067_v14  ;;  %v356_v17 = vpack.c.bf16 %v346_v15, %v346_v15 }
  0xa6   : > { %v334_v16 = vpop.f32.mrf.mxu0  ;;  %v504_v25 = vld [vmem:[#allocation2 + $0x18] sm:$0xf] }
  0xa7   : > { %v351_v18 = vpack.c.bf16 %v334_v16, %v334_v16  ;;  %365 = vst.msk [vmem:[#allocation2 + $0x1c] sm:$0xf] %vm357_vm2, %v356_v17  ;;  %v506_v29 = vsel %vm316_vm0, %v504_v25, 0 }
  0xa8   : > { %v399_v19 = vld [vmem:[#allocation2 + $0x4] sm:$0xf] }
  0xa9   : > { %360 = vst.msk [vmem:[#allocation2 + $0x8] sm:$0xf] %vm357_vm2, %v351_v18  ;;  %v401_v20 = vsel %vm316_vm0, %v399_v19, 0 }
  0xaa   : > { %410 = vmatpush.bf16.msra.mxu2 %v401_v20 }
  0xad   : > { %1033 = vmatmul.msk.bf16.vlgmr.msra.gmra.mxu2 %vm303_vm1, %v1067_v14 }
  0xae   : > { %v336_v21 = vpop.f32.mrf.mxu0  ;;  %v525_v31 = vld [vmem:[#allocation2 + $0x1c] sm:$0xf] }
  0xaf   : > { %v352_v22 = vpack.c.bf16 %v336_v21, %v336_v21  ;;  %v527_v35 = vsel %vm316_vm0, %v525_v31, 0 }
  0xb0   : > { %v420_v23 = vld [vmem:[#allocation2 + $0x8] sm:$0xf] }
  0xb1   : > { %361 = vst.msk [vmem:[#allocation2 + $0xc] sm:$0xf] %vm357_vm2, %v352_v22  ;;  %v422_v24 = vsel %vm316_vm0, %v420_v23, 0 }
  0xb2   : > { %431 = vmatpush.bf16.msrb.mxu3 %v422_v24 }
  0xb5   : > { %1034 = vmatmul.msk.bf16.vlgmr.msrb.gmra.mxu3 %vm303_vm1, %v1067_v14 }
  0xb6   : > { %v339_v26 = vpop.f32.mrf.mxu0 }
  0xb7   : > { %v353_v27 = vpack.c.bf16 %v339_v26, %v339_v26 }
  0xb8   : > { %v441_v28 = vld [vmem:[#allocation2 + $0xc] sm:$0xf] }
  0xb9   : > { %362 = vst.msk [vmem:[#allocation2 + $0x10] sm:$0xf] %vm357_vm2, %v353_v27  ;;  %v443_v30 = vsel %vm316_vm0, %v441_v28, 0 }
  0xba   : > { %452 = vmatpush.bf16.msrb.mxu1 %v443_v30 }
  0xbd   : > { %1035 = vmatmul.msk.bf16.vlgmr.msrb.gmra.mxu1 %vm303_vm1, %v1067_v14 }
  0xbe   : > { %515 = vmatpush.bf16.msra.mxu1 %v506_v29  ;;  %v341_v32 = vpop.f32.mrf.mxu0 }
  0xbf   : > { %v354_v33 = vpack.c.bf16 %v341_v32, %v341_v32 }
  0xc0   : > { %v462_v34 = vld [vmem:[#allocation2 + $0x10] sm:$0xf] }
  0xc1   : > { %363 = vst.msk [vmem:[#allocation2 + $0x14] sm:$0xf] %vm357_vm2, %v354_v33  ;;  %v464_v36 = vsel %vm316_vm0, %v462_v34, 0 }
  0xc2   : > { %473 = vmatpush.bf16.msrb.mxu2 %v464_v36 }
  0xc5   : > { %1036 = vmatmul.msk.bf16.vlgmr.msrb.gmra.mxu2 %vm303_vm1, %v1067_v14 }
  0xc6   : > { %536 = vmatpush.bf16.msra.mxu2 %v527_v35 }
  0xc8   : > { %v483_v37 = vld [vmem:[#allocation2 + $0x14] sm:$0xf] }
  0xc9   : > { %v485_v38 = vsel %vm316_vm0, %v483_v37, 0 }
  0xca   : > { %494 = vmatpush.bf16.msra.mxu3 %v485_v38 }
  0xcd   : > { %1037 = vmatmul.msk.bf16.vlgmr.msra.gmra.mxu3 %vm303_vm1, %v1067_v14  ;;  %1038 = vmatmul.msk.bf16.vlgmr.msra.gmra.mxu1 %vm303_vm1, %v1067_v14 }
  0xd5   : > { %1039 = vmatmul.msk.bf16.vlgmr.msra.gmra.mxu2 %vm303_vm1, %v1067_v14 }
 0x122   : > { %v391_v39 = vpop.f32.mrf.mxu1 }
 0x123   : > { %397 = vst.msk [vmem:[#allocation3] sm:$0xff] %vm396_vm3, %v391_v39 }
 0x12a   : > { %v393_v40 = vpop.f32.mrf.mxu1  ;;  %v546_v52 = vld [vmem:[#allocation3] sm:$0xff] }
 0x12b   : > { %398 = vst.msk [vmem:[#allocation3 + $0x8] sm:$0xff] %vm396_vm3, %v393_v40  ;;  %v562_v58 = vsel %vm396_vm3, %v546_v52, -inf }
 0x130   : > { %v412_v41 = vpop.f32.mrf.mxu2 }
 0x131   : > { %418 = vst.msk [vmem:[#allocation3 + $0x10] sm:$0xff] %vm396_vm3, %v412_v41 }
 0x132   : > { %v547_v11 = vld [vmem:[#allocation3 + $0x8] sm:$0xff] }
 0x133   : > { %v577_v20 = vsel %vm396_vm3, %v547_v11, -inf }
 0x138   : > { %v433_v42 = vpop.f32.mrf.mxu3  ;;  %v414_v43 = vpop.f32.mrf.mxu2  ;;  %v548_v60 = vld [vmem:[#allocation3 + $0x10] sm:$0xff] }
 0x139   : > { %439 = vst.msk [vmem:[#allocation3 + $0x20] sm:$0xff] %vm396_vm3, %v433_v42  ;;  %v563_v2 = vsel %vm396_vm3, %v548_v60, -inf }
 0x13a   : > { %v454_v44 = vpop.f32.mrf.mxu1  ;;  %419 = vst.msk [vmem:[#allocation3 + $0x18] sm:$0xff] %vm396_vm3, %v414_v43 }
 0x13b   : > { %460 = vst.msk [vmem:[#allocation3 + $0x30] sm:$0xff] %vm396_vm3, %v454_v44 }
 0x140   : > { %v435_v45 = vpop.f32.mrf.mxu3  ;;  %v550_v53 = vld [vmem:[#allocation3 + $0x20] sm:$0xff] }
 0x141   : > { %440 = vst.msk [vmem:[#allocation3 + $0x28] sm:$0xff] %vm396_vm3, %v435_v45  ;;  %v564_v59 = vsel %vm396_vm3, %v550_v53, -inf  ;;  %v549_v15 = vld [vmem:[#allocation3 + $0x18] sm:$0xff] }
 0x142   : > { %v456_v46 = vpop.f32.mrf.mxu1  ;;  %v552_v56 = vld [vmem:[#allocation3 + $0x30] sm:$0xff]  ;;  %v565_v0 = vmax.f32 %v562_v58, %v564_v59  ;;  %v578_v25 = vsel %vm396_vm3, %v549_v15, -inf }
 0x143   : > { %461 = vst.msk [vmem:[#allocation3 + $0x38] sm:$0xff] %vm396_vm3, %v456_v46  ;;  %v566_v62 = vsel %vm396_vm3, %v552_v56, -inf }
 0x144   : > { %v567_v4 = vmax.f32 %v563_v2, %v566_v62 }
 0x148   : > { %v475_v47 = vpop.f32.mrf.mxu2  ;;  %v1382_v6 = vld [vmem:[#allocation3 + $0x28] sm:$0xff] }
 0x149   : > { %481 = vst.msk [vmem:[#allocation3 + $0x40] sm:$0xff] %vm396_vm3, %v475_v47  ;;  %v579_v16 = vsel %vm396_vm3, %v1382_v6, -inf }
 0x14a   : > { %v517_v48 = vpop.f32.mrf.mxu1  ;;  %v1386_v12 = vld [vmem:[#allocation3 + $0x38] sm:$0xff]  ;;  %v580_v26 = vmax.f32 %v577_v20, %v579_v16 }
 0x14b   : > { %523 = vst.msk [vmem:[#allocation3 + $0x60] sm:$0xff] %vm396_vm3, %v517_v48  ;;  %v581_v21 = vsel %vm396_vm3, %v1386_v12, -inf }
 0x14c   : > { %v582_v32 = vmax.f32 %v578_v25, %v581_v21 }
 0x150   : > { %v477_v49 = vpop.f32.mrf.mxu2  ;;  %v496_v50 = vpop.f32.mrf.mxu3  ;;  %v554_v57 = vld [vmem:[#allocation3 + $0x40] sm:$0xff] }
 0x151   : > { %482 = vst.msk [vmem:[#allocation3 + $0x48] sm:$0xff] %vm396_vm3, %v477_v49  ;;  %v568_v63 = vsel %vm396_vm3, %v554_v57, -inf }
 0x152   : > { %502 = vst.msk [vmem:[#allocation3 + $0x50] sm:$0xff] %vm396_vm3, %v496_v50  ;;  %v519_v51 = vpop.f32.mrf.mxu1  ;;  %v558_v1 = vld [vmem:[#allocation3 + $0x60] sm:$0xff]  ;;  %v569_v5 = vmax.f32 %v565_v0, %v568_v63 }
 0x153   : > { %524 = vst.msk [vmem:[#allocation3 + $0x68] sm:$0xff] %vm396_vm3, %v519_v51  ;;  %v572_v7 = vsel %vm396_vm3, %v558_v1, -inf }
 0x154   : > { %v573_v17 = vmax.f32 %v569_v5, %v572_v7 }
 0x158   : > { %v498_v54 = vpop.f32.mrf.mxu3  ;;  %v538_v55 = vpop.f32.mrf.mxu2  ;;  %v1388_v13 = vld [vmem:[#allocation3 + $0x48] sm:$0xff] }
 0x159   : > { %503 = vst.msk [vmem:[#allocation3 + $0x58] sm:$0xff] %vm396_vm3, %v498_v54  ;;  %v556_v61 = vld [vmem:[#allocation3 + $0x50] sm:$0xff]  ;;  %v583_v22 = vsel %vm396_vm3, %v1388_v13, -inf }
 0x15a   : > { %544 = vst.msk [vmem:[#allocation3 + $0x70] sm:$0xff] %vm396_vm3, %v538_v55  ;;  %v570_v3 = vsel %vm396_vm3, %v556_v61, -inf  ;;  %v1400_v23 = vld [vmem:[#allocation3 + $0x68] sm:$0xff]  ;;  %v584_v33 = vmax.f32 %v580_v26, %v583_v22 }
 0x15b   : > { %v571_v9 = vmax.f32 %v567_v4, %v570_v3  ;;  %v587_v34 = vsel %vm396_vm3, %v1400_v23, -inf }
 0x15c   : > { %v588_v46 = vmax.f32 %v584_v33, %v587_v34 }
 0x160   : > { %v540_v8 = vpop.f32.mrf.mxu2  ;;  %v1393_v18 = vld [vmem:[#allocation3 + $0x58] sm:$0xff] }
 0x161   : > { %v560_v10 = vld [vmem:[#allocation3 + $0x70] sm:$0xff]  ;;  %545 = vst.msk [vmem:[#allocation3 + $0x78] sm:$0xff] %vm396_vm3, %v540_v8  ;;  %v585_v27 = vsel %vm396_vm3, %v1393_v18, -inf }
 0x162   : > { %v574_v14 = vsel %vm396_vm3, %v560_v10, -inf  ;;  %v586_v41 = vmax.f32 %v582_v32, %v585_v27 }
 0x163   : > { %v575_v19 = vmax.f32 %v571_v9, %v574_v14 }
 0x165   : > { %v576_v24 = vmax.f32 %v573_v17, %v575_v19 }
 0x167   : > { %v592_v28 = vsub.f32 %v546_v52, %v576_v24  ;;  %v594_v29 = vsub.f32 %v548_v60, %v576_v24  ;;  %v596_v30 = vsub.f32 %v550_v53, %v576_v24  ;;  %v598_v31 = vsub.f32 %v552_v56, %v576_v24 }
 0x168   : > { %v600_v35 = vsub.f32 %v554_v57, %v576_v24  ;;  %v1407_v36 = vld [vmem:[#allocation3 + $0x78] sm:$0xff]  ;;  %v602_v37 = vsub.f32 %v556_v61, %v576_v24  ;;  %v604_v42 = vsub.f32 %v558_v1, %v576_v24  ;;  %v606_v44 = vsub.f32 %v560_v10, %v576_v24 }
 0x169   : > { %v608_v38 = vmul.f32 1.442695, %v592_v28  ;;  %v612_v39 = vmul.f32 1.442695, %v594_v29  ;;  %v616_v40 = vmul.f32 1.442695, %v596_v30 }
 0x16a   : > { %v620_v43 = vmul.f32 1.442695, %v598_v31  ;;  %v589_v45 = vsel %vm396_vm3, %v1407_v36, -inf  ;;  %v624_v47 = vmul.f32 1.442695, %v600_v35  ;;  %v688_v28 = vld [vmem:[%s1447_s22] sm:$0xff] }
 0x16b   : > { %1140 = vpow2.f32 %v608_v38  ;;  %v590_v48 = vmax.f32 %v586_v41, %v589_v45  ;;  %v628_v49 = vmul.f32 1.442695, %v602_v37  ;;  %v632_v50 = vmul.f32 1.442695, %v604_v42 }
 0x16c   : > { %1142 = vpow2.f32 %v612_v39  ;;  %v636_v52 = vmul.f32 1.442695, %v606_v44  ;;  %vm690_vm4 = vcmp.eq.s32.totalorder %v688_v28, 0  ;;  %vm692_vm5 = vcmp.eq.s32.totalorder %v688_v28, 1 }
 0x16d   : > { %1144 = vpow2.f32 %v616_v40  ;;  %v591_v51 = vmax.f32 %v588_v46, %v590_v48  ;;  %vm694_vm6 = vcmp.eq.s32.totalorder %v688_v28, 2  ;;  %vm696_vm7 = vcmp.eq.s32.totalorder %v688_v28, 3 }
 0x16e   : > { %1146 = vpow2.f32 %v620_v43  ;;  %vm698_vm8 = vcmp.eq.s32.totalorder %v688_v28, 4  ;;  %vm700_vm9 = vcmp.eq.s32.totalorder %v688_v28, 5  ;;  %vm702_vm10 = vcmp.eq.s32.totalorder %v688_v28, 6 }
 0x16f   : > { %1148 = vpow2.f32 %v624_v47  ;;  %v593_v53 = vsub.f32 %v547_v11, %v591_v51  ;;  %v595_v54 = vsub.f32 %v549_v15, %v591_v51  ;;  %v597_v55 = vsub.f32 %v1382_v6, %v591_v51 }
 0x170   : > { %1150 = vpow2.f32 %v628_v49  ;;  %v599_v57 = vsub.f32 %v1386_v12, %v591_v51  ;;  %v601_v60 = vsub.f32 %v1388_v13, %v591_v51  ;;  %v603_v63 = vsub.f32 %v1393_v18, %v591_v51 }
 0x171   : > { %v1412_v56 = vpop.eup %1140  ;;  %1152 = vpow2.f32 %v632_v50  ;;  %v610_v0 = vmul.f32 1.442695, %v593_v53  ;;  %v614_v1 = vmul.f32 1.442695, %v595_v54  ;;  %v618_v4 = vmul.f32 1.442695, %v597_v55 }
 0x172   : > { %v1415_v58 = vpop.eup %1142  ;;  %v640_v59 = vsel %vm396_vm3, %v1412_v56, 0.0  ;;  %1154 = vpow2.f32 %v636_v52  ;;  %v622_v5 = vmul.f32 1.442695, %v599_v57  ;;  %v605_v9 = vsub.f32 %v1400_v23, %v591_v51 }
 0x173   : > { %v1420_v61 = vpop.eup %1144  ;;  %v641_v62 = vsel %vm396_vm3, %v1415_v58, 0.0  ;;  %1156 = vpow2.f32 %v610_v0  ;;  %v626_v10 = vmul.f32 1.442695, %v601_v60  ;;  %v607_v13 = vsub.f32 %v1407_v36, %v591_v51 }
 0x174   : > { %v1425_v2 = vpop.eup %1146  ;;  %v642_v3 = vadd.f32 %v641_v62, %v640_v59  ;;  %v643_v6 = vsel %vm396_vm3, %v1420_v61, 0.0  ;;  %1158 = vpow2.f32 %v614_v1  ;;  %v630_v16 = vmul.f32 1.442695, %v603_v63 }
 0x175   : > { %v1429_v7 = vpop.eup %1148  ;;  %v645_v12 = vsel %vm396_vm3, %v1425_v2, 0.0  ;;  %1160 = vpow2.f32 %v618_v4  ;;  %v634_v20 = vmul.f32 1.442695, %v605_v9  ;;  %v638_v23 = vmul.f32 1.442695, %v607_v13 }
 0x176   : > { %v644_v8 = vadd.f32 %v643_v6, %v642_v3  ;;  %v1432_v11 = vpop.eup %1150  ;;  %1162 = vpow2.f32 %v622_v5  ;;  %v647_v17 = vsel %vm396_vm3, %v1429_v7, 0.0  ;;  %vm704_vm11 = vcmp.eq.s32.totalorder %v688_v28, 7 }
 0x177   : > { %v1438_v14 = vpop.eup %1152  ;;  %1164 = vpow2.f32 %v626_v10  ;;  %v649_v22 = vsel %vm396_vm3, %v1432_v11, 0.0  ;;  %v1228_v42 = vmov 0   ;;  %v1229_v57 = vmov 0.0  }
 0x178   : > { %v646_v15 = vadd.f32 %v645_v12, %v644_v8  ;;  %v1442_v18 = vpop.eup %1154  ;;  %1166 = vpow2.f32 %v630_v16  ;;  %v651_v29 = vsel %vm396_vm3, %v1438_v14, 0.0  ;;  %v706_v43 = vsel %vm690_vm4, 1, %v1228_v42 }
 0x179   : > { %v1449_v21 = vpop.eup %1156  ;;  %1168 = vpow2.f32 %v634_v20  ;;  %v653_v34 = vsel %vm396_vm3, %v1442_v18, 0.0  ;;  %v708_v44 = vsel %vm692_vm5, 1, %v1228_v42  ;;  %v710_v47 = vsel %vm694_vm6, 1, %v1228_v42 }
 0x17a   : > { %v648_v19 = vadd.f32 %v647_v17, %v646_v15  ;;  %v1453_v24 = vpop.eup %1158  ;;  %v655_v26 = vsel %vm396_vm3, %v1449_v21, 0.0  ;;  %1170 = vpow2.f32 %v638_v23  ;;  %v712_v48 = vsel %vm696_vm7, 1, %v1228_v42 }
 0x17b   : > { %v1457_v27 = vpop.eup %1160  ;;  %v656_v30 = vsel %vm396_vm3, %v1453_v24, 0.0  ;;  %v714_v49 = vsel %vm698_vm8, 1, %v1228_v42  ;;  %v716_v52 = vsel %vm700_vm9, 1, %v1228_v42  ;;  %v718_v53 = vsel %vm702_vm10, 1, %v1228_v42 }
 0x17c   : > { %v650_v25 = vadd.f32 %v649_v22, %v648_v19  ;;  %v1464_v31 = vpop.eup %1162  ;;  %v657_v33 = vadd.f32 %v656_v30, %v655_v26  ;;  %v658_v35 = vsel %vm396_vm3, %v1457_v27, 0.0  ;;  %v720_v54 = vsel %vm704_vm11, 1, %v1228_v42 }
 0x17d   : > { %v1470_v36 = vpop.eup %1164  ;;  %v660_v39 = vsel %vm396_vm3, %v1464_v31, 0.0  ;;  %v1040_v59 = vsel %vm690_vm4, 1.0, %v1229_v57  ;;  %v1042_v60 = vsel %vm692_vm5, 1.0, %v1229_v57  ;;  %v1044_v62 = vsel %vm694_vm6, 1.0, %v1229_v57 }
 0x17e   : > { %v652_v32 = vadd.f32 %v651_v29, %v650_v25  ;;  %v659_v38 = vadd.f32 %v658_v35, %v657_v33  ;;  %v1474_v40 = vpop.eup %1166  ;;  %v662_v45 = vsel %vm396_vm3, %v1470_v36, 0.0  ;;  %v1046_v0 = vsel %vm696_vm7, 1.0, %v1229_v57 }
 0x17f   : > { %v1482_v46 = vpop.eup %1168  ;;  %v664_v55 = vsel %vm396_vm3, %v1474_v40, 0.0  ;;  %v1048_v1 = vsel %vm698_vm8, 1.0, %v1229_v57  ;;  %v1050_v3 = vsel %vm700_vm9, 1.0, %v1229_v57  ;;  %v1052_v6 = vsel %vm702_vm10, 1.0, %v1229_v57 }
 0x180   : > { %v654_v37 = vadd.f32 %v653_v34, %v652_v32  ;;  %v661_v41 = vadd.f32 %v660_v39, %v659_v38  ;;  %v1490_v51 = vpop.eup %1170  ;;  %v666_v4 = vsel %vm396_vm3, %v1482_v46, 0.0  ;;  %v1054_v8 = vsel %vm704_vm11, 1.0, %v1229_v57 }
 0x181   : > { %v668_v10 = vsel %vm396_vm3, %v1490_v51, 0.0 }
 0x182   : > { %1172 = vrcp.f32 %v654_v37  ;;  %v663_v50 = vadd.f32 %v662_v45, %v661_v41 }
 0x184   : > { %v665_v63 = vadd.f32 %v664_v55, %v663_v50  ;;  %v689_v50 = vld [vmem:[%s1447_s22 + $0x8] sm:$0xff] }
 0x185   : > { %vm691_vm12 = vcmp.eq.s32.totalorder %v689_v50, 0  ;;  %vm693_vm13 = vcmp.eq.s32.totalorder %v689_v50, 1  ;;  %vm695_vm14 = vcmp.eq.s32.totalorder %v689_v50, 2  ;;  %vm697_vm15 = vcmp.eq.s32.totalorder %v689_v50, 3 }
 0x186   : > { %v667_v9 = vadd.f32 %v666_v4, %v665_v63  ;;  %vm699_vm0 = vcmp.eq.s32.totalorder %v689_v50, 4  ;;  %vm701_vm1 = vcmp.eq.s32.totalorder %v689_v50, 5  ;;  %vm703_vm2 = vcmp.eq.s32.totalorder %v689_v50, 6 }
 0x187   : > { %vm705_vm4 = vcmp.eq.s32.totalorder %v689_v50, 7 }
 0x188   : > { %v1173_v5 = vpop.eup %1172  ;;  %v669_v33 = vadd.f32 %v668_v10, %v667_v9 }
 0x189   : > { %v672_v12 = vmul.f32 %v1173_v5, %v1412_v56  ;;  %v674_v13 = vmul.f32 %v1173_v5, %v1415_v58  ;;  %v676_v15 = vmul.f32 %v1173_v5, %v1420_v61  ;;  %v678_v16 = vmul.f32 %v1173_v5, %v1425_v2 }
 0x18a   : > { %v680_v17 = vmul.f32 %v1173_v5, %v1429_v7  ;;  %v682_v19 = vmul.f32 %v1173_v5, %v1432_v11  ;;  %v684_v20 = vmul.f32 %v1173_v5, %v1438_v14  ;;  %v686_v22 = vmul.f32 %v1173_v5, %v1442_v18 }
 0x18b   : > { %v738_v23 = vsub.f32 %v1040_v59, %v672_v12  ;;  %v740_v25 = vsub.f32 %v1042_v60, %v674_v13  ;;  %v742_v26 = vsub.f32 %v1044_v62, %v676_v15  ;;  %v744_v28 = vsub.f32 %v1046_v0, %v678_v16 }
 0x18c   : > { %v746_v56 = vsub.f32 %v1048_v1, %v680_v17  ;;  %v748_v58 = vsub.f32 %v1050_v3, %v682_v19  ;;  %v750_v61 = vsub.f32 %v1052_v6, %v684_v20  ;;  %v752_v29 = vsub.f32 %v1054_v8, %v686_v22 }
 0x18d   : > { %v754_v2 = vand.u32 2147483647, %v738_v23  ;;  %v756_v7 = vand.u32 2147483647, %v740_v25  ;;  %v758_v30 = vand.u32 2147483647, %v742_v26  ;;  %1174 = vrcp.f32 %v669_v33 }
 0x18e   : > { %v760_v11 = vand.u32 2147483647, %v744_v28  ;;  %v762_v32 = vand.u32 2147483647, %v746_v56  ;;  %v764_v14 = vand.u32 2147483647, %v748_v58 }
 0x18f   : > { %v766_v18 = vand.u32 2147483647, %v750_v61  ;;  %v768_v34 = vand.u32 2147483647, %v752_v29  ;;  %v786_v35 = vmul.u32 2, %v754_v2  ;;  %v788_v37 = vmul.u32 2, %v756_v7 }
 0x190   : > { %v790_v38 = vmul.u32 2, %v758_v30  ;;  %v792_v39 = vmul.u32 2, %v760_v11  ;;  %v794_v41 = vmul.u32 2, %v762_v32  ;;  %v796_v45 = vmul.u32 2, %v764_v14 }
 0x191   : > { %v798_v55 = vmul.u32 2, %v766_v18  ;;  %v800_v59 = vmul.u32 2, %v768_v34  ;;  %v802_v60 = vadd.s32 %v786_v35, %v706_v43  ;;  %v804_v62 = vadd.s32 %v788_v37, %v708_v44 }
 0x192   : > { %v806_v63 = vadd.s32 %v790_v38, %v710_v47  ;;  %v808_v0 = vadd.s32 %v792_v39, %v712_v48  ;;  %v810_v1 = vadd.s32 %v794_v41, %v714_v49  ;;  %v812_v3 = vadd.s32 %v796_v45, %v716_v52 }
 0x193   : > { %v814_v4 = vadd.s32 %v798_v55, %v718_v53  ;;  %v818_v5 = vsub.s32 0, %v802_v60  ;;  %v820_v6 = vsub.s32 0, %v804_v62  ;;  %v816_v8 = vadd.s32 %v800_v59, %v720_v54  ;;  %v1175_v23 = vpop.eup %1174 }
 0x194   : > { %v822_v9 = vsub.s32 0, %v806_v63  ;;  %v824_v10 = vsub.s32 0, %v808_v0  ;;  %v826_v12 = vsub.s32 0, %v810_v1  ;;  %v828_v43 = vsub.s32 0, %v812_v3 }
 0x195   : > { %834 = vst.msk [vmem:[%s1534_s26] sm:$0xff] %vm396_vm3, %v818_v5  ;;  %v707_v44 = vsel %vm691_vm12, 1, %v1228_v42  ;;  %v830_v47 = vsub.s32 0, %v814_v4  ;;  %v709_v48 = vsel %vm693_vm13, 1, %v1228_v42  ;;  %v711_v49 = vsel %vm695_vm14, 1, %v1228_v42 }
 0x196   : > { %836 = vst.msk [vmem:[%s1534_s26 + $0x10] sm:$0xff] %vm396_vm3, %v820_v6  ;;  %v713_v52 = vsel %vm697_vm15, 1, %v1228_v42  ;;  %v832_v53 = vsub.s32 0, %v816_v8  ;;  %v715_v54 = vsel %vm699_vm0, 1, %v1228_v42  ;;  %v717_v13 = vsel %vm701_vm1, 1, %v1228_v42 }
 0x197   : > { %838 = vst.msk [vmem:[%s1534_s26 + $0x20] sm:$0xff] %vm396_vm3, %v822_v9  ;;  %v719_v15 = vsel %vm703_vm2, 1, %v1228_v42  ;;  %v721_v16 = vsel %vm705_vm4, 1, %v1228_v42  ;;  %v1041_v17 = vsel %vm691_vm12, 1.0, %v1229_v57  ;;  %v1043_v19 = vsel %vm693_vm13, 1.0, %v1229_v57 }
 0x198   : > { %840 = vst.msk [vmem:[%s1534_s26 + $0x30] sm:$0xff] %vm396_vm3, %v824_v10  ;;  %v1045_v20 = vsel %vm695_vm14, 1.0, %v1229_v57  ;;  %v1047_v22 = vsel %vm697_vm15, 1.0, %v1229_v57  ;;  %v1049_v42 = vsel %vm699_vm0, 1.0, %v1229_v57  ;;  %v1051_v25 = vsel %vm701_vm1, 1.0, %v1229_v57 }
 0x199   : > { %842 = vst.msk [vmem:[%s1534_s26 + $0x40] sm:$0xff] %vm396_vm3, %v826_v12  ;;  %v1053_v26 = vsel %vm703_vm2, 1.0, %v1229_v57  ;;  %v1055_v28 = vsel %vm705_vm4, 1.0, %v1229_v57  ;;  %v673_v56 = vmul.f32 %v1175_v23, %v1449_v21  ;;  %v675_v58 = vmul.f32 %v1175_v23, %v1453_v24 }
 0x19a   : > { %844 = vst.msk [vmem:[%s1534_s26 + $0x50] sm:$0xff] %vm396_vm3, %v828_v43  ;;  %v677_v61 = vmul.f32 %v1175_v23, %v1457_v27  ;;  %v679_v29 = vmul.f32 %v1175_v23, %v1464_v31  ;;  %v681_v2 = vmul.f32 %v1175_v23, %v1470_v36  ;;  %v683_v7 = vmul.f32 %v1175_v23, %v1474_v40 }
 0x19b   : > { %846 = vst.msk [vmem:[%s1534_s26 + $0x60] sm:$0xff] %vm396_vm3, %v830_v47  ;;  %v685_v30 = vmul.f32 %v1175_v23, %v1482_v46  ;;  %v687_v57 = vmul.f32 %v1175_v23, %v1490_v51  ;;  %v739_v11 = vsub.f32 %v1041_v17, %v673_v56  ;;  %v741_v32 = vsub.f32 %v1043_v19, %v675_v58 }
 0x19c   : > { %848 = vst.msk [vmem:[%s1534_s26 + $0x70] sm:$0xff] %vm396_vm3, %v832_v53  ;;  %v743_v14 = vsub.f32 %v1045_v20, %v677_v61  ;;  %v745_v33 = vsub.f32 %v1047_v22, %v679_v29  ;;  %v747_v18 = vsub.f32 %v1049_v42, %v681_v2  ;;  %v749_v21 = vsub.f32 %v1051_v25, %v683_v7 }
 0x19d   : > { %v751_v34 = vsub.f32 %v1053_v26, %v685_v30  ;;  %v753_v24 = vsub.f32 %v1055_v28, %v687_v57  ;;  %v755_v35 = vand.u32 2147483647, %v739_v11  ;;  %v757_v27 = vand.u32 2147483647, %v741_v32 }
 0x19e   : > { %v759_v37 = vand.u32 2147483647, %v743_v14  ;;  %v761_v31 = vand.u32 2147483647, %v745_v33  ;;  %v763_v38 = vand.u32 2147483647, %v747_v18 }
 0x19f   : > { %v765_v36 = vand.u32 2147483647, %v749_v21  ;;  %v767_v39 = vand.u32 2147483647, %v751_v34  ;;  %v769_v40 = vand.u32 2147483647, %v753_v24 }
 0x1a0   : > { %v787_v41 = vmul.u32 2, %v755_v35  ;;  %v789_v46 = vmul.u32 2, %v757_v27  ;;  %v791_v45 = vmul.u32 2, %v759_v37  ;;  %v793_v51 = vmul.u32 2, %v761_v31 }
 0x1a1   : > { %v795_v50 = vmul.u32 2, %v763_v38  ;;  %v797_v55 = vmul.u32 2, %v765_v36  ;;  %v799_v59 = vmul.u32 2, %v767_v39  ;;  %v801_v60 = vmul.u32 2, %v769_v40 }
 0x1a2   : > { %v803_v62 = vadd.s32 %v787_v41, %v707_v44  ;;  %v805_v63 = vadd.s32 %v789_v46, %v709_v48  ;;  %v807_v0 = vadd.s32 %v791_v45, %v711_v49  ;;  %v809_v1 = vadd.s32 %v793_v51, %v713_v52 }
 0x1a3   : > { %v811_v3 = vadd.s32 %v795_v50, %v715_v54  ;;  %v813_v4 = vadd.s32 %v797_v55, %v717_v13  ;;  %v815_v5 = vadd.s32 %v799_v59, %v719_v15  ;;  %v817_v9 = vadd.s32 %v801_v60, %v721_v16 }
 0x1a4   : > { %v819_v6 = vsub.s32 0, %v803_v62  ;;  %v821_v8 = vsub.s32 0, %v805_v63  ;;  %v823_v10 = vsub.s32 0, %v807_v0  ;;  %v825_v12 = vsub.s32 0, %v809_v1 }
 0x1a5   : > { %v827_v43 = vsub.s32 0, %v811_v3  ;;  %v829_v44 = vsub.s32 0, %v813_v4  ;;  %v831_v47 = vsub.s32 0, %v815_v5  ;;  %v833_v48 = vsub.s32 0, %v817_v9 }
 0x1a6   : > { %835 = vst.msk [vmem:[%s1534_s26 + $0x8] sm:$0xff] %vm396_vm3, %v819_v6 }
 0x1a7   : > { %837 = vst.msk [vmem:[%s1534_s26 + $0x18] sm:$0xff] %vm396_vm3, %v821_v8 }
 0x1a8   : > { %839 = vst.msk [vmem:[%s1534_s26 + $0x28] sm:$0xff] %vm396_vm3, %v823_v10 }
 0x1a9   : > { %841 = vst.msk [vmem:[%s1534_s26 + $0x38] sm:$0xff] %vm396_vm3, %v825_v12 }
 0x1aa   : > { %843 = vst.msk [vmem:[%s1534_s26 + $0x48] sm:$0xff] %vm396_vm3, %v827_v43 }
 0x1ab   : > { %845 = vst.msk [vmem:[%s1534_s26 + $0x58] sm:$0xff] %vm396_vm3, %v829_v44 }
 0x1ac   : > { %847 = vst.msk [vmem:[%s1534_s26 + $0x68] sm:$0xff] %vm396_vm3, %v831_v47 }
 0x1ad   : > { %849 = vst.msk [vmem:[%s1534_s26 + $0x78] sm:$0xff] %vm396_vm3, %v833_v48 }
 0x1ae   : > { %s1068_s30 = sshll.u32 %s1218_s18, 4  ;;  %s875_s5 = sshll.u32 %s1534_s26, 4  ;;  %s876_s5 = int_to_ptr.vmem [resolvable:$true] %s875_s5 }
 0x1af   : > { %s864_s8 = scalar_lea.hbm %s1655_s4, %s1068_s30  ;;  %s1230_s10 = smov 256  }
 0x1b0   : > { %s877_s9 = sshll.u32 %s864_s8, 4  ;;  %1070 = sst [smem:[#allocation7]] (%p1302_p4), %s1230_s10  ;;  %s878_s9 = int_to_ptr.hbm [resolvable:$true] %s877_s9 }
 0x1b1   : > { %s1231_s11 = smov 512   ;;  %s1232_s12 = smov 2  }
 0x1b2   : > { %1071 = sst [smem:[#allocation7 + $0x1]] (%p1302_p4), %s1231_s11  ;;  %s1233_s18 = smov 128  }
 0x1b3   : > { %1072 = sst [smem:[#allocation7 + $0x2]] (%p1302_p4), %s1232_s12  ;;  %s1234_s13 = smov 8  }
 0x1b4   : > { %1073 = sst [smem:[#allocation7 + $0x3]] (%p1302_p4), %s1233_s18  ;;  %s1235_s14 = smov [#allocation6]  }
 0x1b5   : > { %1074 = sst [smem:[#allocation7 + $0x4]] (%p1302_p4), %s1233_s18  ;;  %s1236_s21 = smov 0  }
 0x1b6   : > { %1075 = sst [smem:[#allocation7 + $0x5]] (%p1302_p4), %s1234_s13 }
 0x1b7   : > { %1076 = dma.general (%p1302_p4), %s876_s5, 2048, %s878_s9, %s851_s29, %s1235_s14, [#allocation7], %s1236_s21, 0  }
 0x1b8 PF: > { %p1082_p12 = scmp.ge.s32.totalorder %s1226_s20, 2  ;;  %s905_s22 = sand.u32 1, %s1206_s15  }
 0x1b9   : > { %s906_s24 = scalar_lea.sflag [#allocation5], %s905_s22 }
 0x1ba   : > { %p1079_p13 = pnand %p1082_p12, %p1309_p8 }
 0x1bc   : > { %p1080_p0 = pneg %p1079_p13 }
 0x1be   : > { %1201 = dma.done.wait (%p1080_p0), %s906_s24, 2048  }
 0x1bf   : > { %1203 = vsyncadd (%p1080_p0), %s906_s24, 4294965248  ;;  %s17_s20 = sadd.s32 1, %s1226_s20   ;;  %s1658_s15 = smov %s1210_s16 }
 0x1c0   : > { %p14_p1 = scmp.ge.s32.totalorder %s17_s20, 4   ;;  %s1659_s16 = smov %s1214_s17 }
 0x1c1   : > { %s1660_s17 = smov %s1315_s28  ;;  %s1661_s18 = smov %s1222_s19 }
 0x1c2   : > { %s1662_s19 = smov %s1664_s23  ;;  %16 = sbr.rel (!%p14_p1) target bundleno = 4 (0x4), region = 93 }
 0x1c7   :  { %912 = vsyncpa [#allocation5], 1 }
 0x1c8   :  { %914 = vsyncpa [#allocation5 + $0x1], 1 }

</bundles_post_ra>
